<compile_context>
chip_gen: v7x
topology: tpu7x:2x2x1
jax: 0.10.0
libtpu: 0.0.40
codegen_flags: <defaults>
</compile_context>

<pallas_src>
import jax
import jax.numpy as jnp
from jax import lax
from jax.experimental import pallas as pl
from jax.experimental.pallas import tpu as pltpu

LANE = 128


def decoder_kernel(ent_ref, rel_ref, tim_ref,
                   w_ent_ref, w_rel_ref, w_tim_ref, b_ref,
                   all_ent_ref, o_ref):
    """One grid step scores the whole batch against a (TN, D) entity tile."""
    contract_last = (((1,), (1,)), ((), ()))   # contract last dim of both operands

    # tanh on entity embeddings (EUP).
    ent = jnp.tanh(ent_ref[...])                                   # (B, D)

    # Linear(2D+1 -> D) applied to the virtual concat [tanh(ent), rel, tim]:
    #   h = tanh(ent) @ W_ent^T + rel @ W_rel^T + tim * w_tim + b
    # (weights kept in PyTorch (out, in) layout -> contract on last dims,
    #  no transposes needed anywhere).
    h = lax.dot_general(ent, w_ent_ref[...], contract_last,
                        preferred_element_type=jnp.float32)        # (B, D)
    h = h + lax.dot_general(rel_ref[...], w_rel_ref[...], contract_last,
                            preferred_element_type=jnp.float32)    # (B, D)
    h = h + tim_ref[...] * w_tim_ref[...] + b_ref[...]             # VPU epilogue

    # Dropout: eval-mode identity (deterministic).
    # TODO(synk): training-mode dropout (pltpu.prng_* mask + 1/(1-p) scaling).
    h = jnp.maximum(h, 0.0)                                        # relu

    # Score against this tile of entities: (B, D) . (TN, D)^T -> (B, TN).
    o_ref[...] = lax.dot_general(h, all_ent_ref[...], contract_last,
                                 preferred_element_type=jnp.float32)


def _choose_entity_tile(n, d, itemsize=4, budget_bytes=16 * 1024 * 1024):
    """Pick a lane-dense (multiple of 128) N-tile whose double-buffered
    (TN, D) block stays well within the scoped-VMEM budget on every TPU
    generation (v5e default 16 MiB scoped; v7x only 64 MiB physical)."""
    tn = min(((n + LANE - 1) // LANE) * LANE, 1024)
    while tn > LANE and 2 * tn * d * itemsize > budget_bytes:
        tn //= 2
    return max(tn, LANE)


def decoder_forward(ent_emb, rel_emb, tim_emb, all_ent_emb, W, b):
    """ent_emb (B,D), rel_emb (B,D), tim_emb (B,1), all_ent_emb (N,D),
       W (D, 2D+1), b (D,)  ->  (B, N)"""
    B, D = ent_emb.shape
    N = all_ent_emb.shape[0]

    TN = _choose_entity_tile(N, D)
    n_pad = pl.cdiv(N, TN) * TN
    if n_pad != N:
        # Zero-pad entities so every output tile is a full, unmasked,
        # lane-dense (B, TN) store; padded scores are sliced off below.
        all_ent_emb = jnp.pad(all_ent_emb, ((0, n_pad - N), (0, 0)))

    # Split the Linear(2D+1 -> D) weight (cheap slices of a tiny matrix;
    # kept in (out, in) layout -> no transposes).
    w_ent = W[:, :D]                        # (D, D)
    w_rel = W[:, D:2 * D]                   # (D, D)
    w_tim = W[:, 2 * D:].reshape(1, D)      # (1, D) per-output-feature tim weight
    b_row = b.reshape(1, D)                 # (1, D)

    # Constant index_map => fetched once, VMEM-resident across all N tiles.
    resident = lambda shape: pl.BlockSpec(shape, lambda j, _s=shape: (0,) * len(_s))

    out = pl.pallas_call(
        decoder_kernel,
        out_shape=jax.ShapeDtypeStruct((B, n_pad), jnp.float32),
        grid=(n_pad // TN,),
        in_specs=[
            resident((B, D)),                           # ent_emb
            resident((B, D)),                           # rel_emb
            resident((B, 1)),                           # tim_emb
            resident((D, D)),                           # W_ent
            resident((D, D)),                           # W_rel
            resident((1, D)),                           # w_tim
            resident((1, D)),                           # bias
            pl.BlockSpec((TN, D), lambda j: (j, 0)),    # entity tile (pipelined)
        ],
        out_specs=pl.BlockSpec((B, TN), lambda j: (0, j)),   # lane-dense output tile
        compiler_params=pltpu.CompilerParams(
            dimension_semantics=("parallel",),   # split entity tiles across TCs (v7x)
            vmem_limit_bytes=32 * 1024 * 1024,   # explicit, safe on v5e/v6e/v7x
        ),
    )(ent_emb, rel_emb, tim_emb, w_ent, w_rel, w_tim, b_row, all_ent_emb)

    return out[:, :N] if n_pad != N else out


def decoder_reference(ent_emb, rel_emb, tim_emb, all_ent_emb, W, b):
    ent = jnp.tanh(ent_emb)
    x = jnp.concatenate([ent, rel_emb, tim_emb], axis=1)
    x = x @ W.T + b
    x = jnp.maximum(x, 0.0)
    return x @ all_ent_emb.T


if __name__ == "__main__":
    key = jax.random.PRNGKey(0)
    B, D, N = 8, 32, 64            # batch, embedding_dim, num entities
    k = jax.random.split(key, 6)

    ent_emb = jax.random.normal(k[0], (B, D), dtype=jnp.float32)
    rel_emb = jax.random.normal(k[1], (B, D), dtype=jnp.float32)
    tim_emb = jax.random.normal(k[2], (B, 1), dtype=jnp.float32)
    all_ent_emb = jax.random.normal(k[3], (N, D), dtype=jnp.float32)

    # Deterministic Linear(2D+1 -> D) parameters (Kaiming-uniform-ish scale).
    fan_in = 2 * D + 1
    bound = 1.0 / (fan_in ** 0.5)
    W = jax.random.uniform(k[4], (D, fan_in), dtype=jnp.float32,
                           minval=-bound, maxval=bound)
    b = jax.random.uniform(k[5], (D,), dtype=jnp.float32,
                           minval=-bound, maxval=bound)

    out = decoder_forward(ent_emb, rel_emb, tim_emb, all_ent_emb, W, b)
    out = jax.block_until_ready(out)

    ref = decoder_reference(ent_emb, rel_emb, tim_emb, all_ent_emb, W, b)
    assert out.shape == (B, N)
    assert jnp.allclose(out, ref, atol=1e-4, rtol=1e-4)

    print("KERNEL_OK")
</pallas_src>

<mosaic_0001>
module attributes {stable_mosaic.version = 11 : i64} {
  func.func @decoder_kernel(%arg0: i32, %arg1: memref<8x32xf32, #tpu.memory_space<vmem>>, %arg2: memref<8x32xf32, #tpu.memory_space<vmem>>, %arg3: memref<8x1xf32, #tpu.memory_space<vmem>>, %arg4: memref<32x32xf32, #tpu.memory_space<vmem>>, %arg5: memref<32x32xf32, #tpu.memory_space<vmem>>, %arg6: memref<1x32xf32, #tpu.memory_space<vmem>>, %arg7: memref<1x32xf32, #tpu.memory_space<vmem>>, %arg8: memref<128x32xf32, #tpu.memory_space<vmem>>, %arg9: memref<8x128xf32, #tpu.memory_space<vmem>>) attributes {dimension_semantics = [#tpu.dimension_semantics<parallel>], iteration_bounds = array<i64: 1>, scalar_prefetch = 0 : i64, scratch_operands = 0 : i64, tpu.core_type = #tpu.core_type<tc>, window_params = [{pipeline_mode = #tpu.pipeline_mode<synchronous>, transform_indices = @transform_0, window_bounds = array<i64: 8, 32>}, {pipeline_mode = #tpu.pipeline_mode<synchronous>, transform_indices = @transform_1, window_bounds = array<i64: 8, 32>}, {pipeline_mode = #tpu.pipeline_mode<synchronous>, transform_indices = @transform_2, window_bounds = array<i64: 8, 1>}, {pipeline_mode = #tpu.pipeline_mode<synchronous>, transform_indices = @transform_3, window_bounds = array<i64: 32, 32>}, {pipeline_mode = #tpu.pipeline_mode<synchronous>, transform_indices = @transform_4, window_bounds = array<i64: 32, 32>}, {pipeline_mode = #tpu.pipeline_mode<synchronous>, transform_indices = @transform_5, window_bounds = array<i64: 1, 32>}, {pipeline_mode = #tpu.pipeline_mode<synchronous>, transform_indices = @transform_6, window_bounds = array<i64: 1, 32>}, {transform_indices = @transform_7, window_bounds = array<i64: 128, 32>}, {transform_indices = @transform_8, window_bounds = array<i64: 8, 128>}]} {
    %c0 = arith.constant 0 : index
    %c0_0 = arith.constant 0 : index
    %0 = vector.load %arg1[%c0, %c0_0] : memref<8x32xf32, #tpu.memory_space<vmem>>, vector<8x32xf32>
    %1 = math.tanh %0 : vector<8x32xf32>
    %c0_1 = arith.constant 0 : index
    %c0_2 = arith.constant 0 : index
    %2 = vector.load %arg4[%c0_1, %c0_2] : memref<32x32xf32, #tpu.memory_space<vmem>>, vector<32x32xf32>
    %cst = arith.constant dense<0.000000e+00> : vector<8x32xf32>
    %3 = tpu.matmul %1, %2, %cst {dimension_numbers = #tpu.dot_dimension_numbers<[1], [1], [0], [0], [0, 0, 1, 0], [], []>} : vector<8x32xf32>, vector<32x32xf32>, vector<8x32xf32> -> vector<8x32xf32>
    %c0_3 = arith.constant 0 : index
    %c0_4 = arith.constant 0 : index
    %4 = vector.load %arg2[%c0_3, %c0_4] : memref<8x32xf32, #tpu.memory_space<vmem>>, vector<8x32xf32>
    %c0_5 = arith.constant 0 : index
    %c0_6 = arith.constant 0 : index
    %5 = vector.load %arg5[%c0_5, %c0_6] : memref<32x32xf32, #tpu.memory_space<vmem>>, vector<32x32xf32>
    %cst_7 = arith.constant dense<0.000000e+00> : vector<8x32xf32>
    %6 = tpu.matmul %4, %5, %cst_7 {dimension_numbers = #tpu.dot_dimension_numbers<[1], [1], [0], [0], [0, 0, 1, 0], [], []>} : vector<8x32xf32>, vector<32x32xf32>, vector<8x32xf32> -> vector<8x32xf32>
    %7 = arith.addf %3, %6 : vector<8x32xf32>
    %c0_8 = arith.constant 0 : index
    %c0_9 = arith.constant 0 : index
    %8 = vector.load %arg3[%c0_8, %c0_9] : memref<8x1xf32, #tpu.memory_space<vmem>>, vector<8x1xf32>
    %c0_10 = arith.constant 0 : index
    %c0_11 = arith.constant 0 : index
    %9 = vector.load %arg6[%c0_10, %c0_11] : memref<1x32xf32, #tpu.memory_space<vmem>>, vector<1x32xf32>
    %10 = vector.broadcast %8 : vector<8x1xf32> to vector<8x32xf32>
    %11 = vector.broadcast %9 : vector<1x32xf32> to vector<8x32xf32>
    %12 = arith.mulf %10, %11 : vector<8x32xf32>
    %13 = arith.addf %7, %12 : vector<8x32xf32>
    %c0_12 = arith.constant 0 : index
    %c0_13 = arith.constant 0 : index
    %14 = vector.load %arg7[%c0_12, %c0_13] : memref<1x32xf32, #tpu.memory_space<vmem>>, vector<1x32xf32>
    %15 = vector.broadcast %14 : vector<1x32xf32> to vector<8x32xf32>
    %16 = arith.addf %13, %15 : vector<8x32xf32>
    %cst_14 = arith.constant 0.000000e+00 : f32
    %17 = vector.broadcast %cst_14 : f32 to vector<8x32xf32>
    %18 = arith.maximumf %16, %17 : vector<8x32xf32>
    %c0_15 = arith.constant 0 : index
    %c0_16 = arith.constant 0 : index
    %19 = vector.load %arg8[%c0_15, %c0_16] : memref<128x32xf32, #tpu.memory_space<vmem>>, vector<128x32xf32>
    %cst_17 = arith.constant dense<0.000000e+00> : vector<8x128xf32>
    %20 = tpu.matmul %18, %19, %cst_17 {dimension_numbers = #tpu.dot_dimension_numbers<[1], [1], [0], [0], [0, 0, 1, 0], [], []>} : vector<8x32xf32>, vector<128x32xf32>, vector<8x128xf32> -> vector<8x128xf32>
    %c0_18 = arith.constant 0 : index
    %c0_19 = arith.constant 0 : index
    %21 = vector.load %arg9[%c0_18, %c0_19] : memref<8x128xf32, #tpu.memory_space<vmem>>, vector<8x128xf32>
    tpu.vector_store %arg9[%c0_18, %c0_19], %20 {strides = array<i32>} : memref<8x128xf32, #tpu.memory_space<vmem>>, vector<8x128xf32>,
    return
  }
  func.func @transform_0(%arg0: i32) -> (i32, i32) {
    %c0_i32 = arith.constant 0 : i32
    %c0_i32_0 = arith.constant 0 : i32
    %c0_i32_1 = arith.constant 0 : i32
    return %c0_i32, %c0_i32_0 : i32, i32
  }
  func.func @transform_1(%arg0: i32) -> (i32, i32) {
    %c0_i32 = arith.constant 0 : i32
    %c0_i32_0 = arith.constant 0 : i32
    %c0_i32_1 = arith.constant 0 : i32
    return %c0_i32, %c0_i32_0 : i32, i32
  }
  func.func @transform_2(%arg0: i32) -> (i32, i32) {
    %c0_i32 = arith.constant 0 : i32
    %c0_i32_0 = arith.constant 0 : i32
    %c0_i32_1 = arith.constant 0 : i32
    return %c0_i32, %c0_i32_0 : i32, i32
  }
  func.func @transform_3(%arg0: i32) -> (i32, i32) {
    %c0_i32 = arith.constant 0 : i32
    %c0_i32_0 = arith.constant 0 : i32
    %c0_i32_1 = arith.constant 0 : i32
    return %c0_i32, %c0_i32_0 : i32, i32
  }
  func.func @transform_4(%arg0: i32) -> (i32, i32) {
    %c0_i32 = arith.constant 0 : i32
    %c0_i32_0 = arith.constant 0 : i32
    %c0_i32_1 = arith.constant 0 : i32
    return %c0_i32, %c0_i32_0 : i32, i32
  }
  func.func @transform_5(%arg0: i32) -> (i32, i32) {
    %c0_i32 = arith.constant 0 : i32
    %c0_i32_0 = arith.constant 0 : i32
    %c0_i32_1 = arith.constant 0 : i32
    return %c0_i32, %c0_i32_0 : i32, i32
  }
  func.func @transform_6(%arg0: i32) -> (i32, i32) {
    %c0_i32 = arith.constant 0 : i32
    %c0_i32_0 = arith.constant 0 : i32
    %c0_i32_1 = arith.constant 0 : i32
    return %c0_i32, %c0_i32_0 : i32, i32
  }
  func.func @transform_7(%arg0: i32) -> (i32, i32) {
    %c0_i32 = arith.constant 0 : i32
    %c0_i32_0 = arith.constant 0 : i32
    return %arg0, %c0_i32 : i32, i32
  }
  func.func @transform_8(%arg0: i32) -> (i32, i32) {
    %c0_i32 = arith.constant 0 : i32
    %c0_i32_0 = arith.constant 0 : i32
    return %c0_i32, %arg0 : i32, i32
  }
}

</mosaic_0001>

<bundles_post_ra>
// kernel: tpu_custom_call.1
= control target key start
LH: loop header
LB: loop body
LE: loop exit
PB: predicated region body
PF: predicated region fallthrough
CT: control target
= control target key end

     0   :  { %vm41_vm0 = vcmask 261120   ;;  %v581_v2 = vmov 0.0|0.0   ;;  %vm582_vm2 = vmmov 0   ;;  %v583_v5 = vmov 0.0   ;;  %s778_s0 = inlined_call_operand.vmem [shape: f32[8,32], index: 0, kind: input, shape index: {}]   ;;  %s779_s1 = inlined_call_operand.vmem [shape: f32[8,32], index: 1, kind: input, shape index: {}]   ;;  %s780_s2 = inlined_call_operand.vmem [shape: f32[8,1], index: 2, kind: input, shape index: {}]   ;;  %s781_s3 = inlined_call_operand.vmem [shape: f32[32,32], index: 3, kind: input, shape index: {}]   ;;  %s782_s4 = inlined_call_operand.vmem [shape: f32[32,32], index: 4, kind: input, shape index: {}]   ;;  %s783_s5 = inlined_call_operand.vmem [shape: f32[1,32], index: 5, kind: input, shape index: {}]   ;;  %s784_s6 = inlined_call_operand.vmem [shape: f32[1,32], index: 6, kind: input, shape index: {}]   ;;  %s785_s7 = inlined_call_operand.vmem [shape: f32[128,32], index: 7, kind: input, shape index: {}]   ;;  %s786_s8 = inlined_call_operand.hbm [shape: f32[8,128], index: 8, kind: output, shape index: {}]  }
   0x1   :  { %v37_v0 = vld [vmem:[%s782_s4] sm:$0xff]  ;;  %v38_v1 = vld [vmem:[%s782_s4 + $0x8] sm:$0xff]  ;;  %501 = vmatprep.subr.bf16.mxu1 %v581_v2  ;;  %vm640_vm1 = vmpackc.low %vm41_vm0, %vm41_vm0  ;;  %517 = vmatprep.subr.bf16.mxu0 %v581_v2  ;;  %v584_v6 = vmov 0  }
   0x2   :  { %v502_v3 = vpack.c.bf16 %v38_v1, %v37_v0  ;;  %452 = vmatprep.mubr.msk.f32.mxu1 %vm582_vm2, %v583_v5  ;;  %554 = vset.pattern.permute.xlu0 %v584_v6  ;;  %v39_v7 = vld [vmem:[%s782_s4 + $0x10] sm:$0xff]  ;;  %v212_v8 = vld [vmem:[%s780_s2] sm:$0xff]  ;;  %v40_v9 = vld [vmem:[%s782_s4 + $0x18] sm:$0xff] }
   0x3   :  { %498 = vmatprep.mubr.msk.f32.mxu0 %vm582_vm2, %v583_v5  ;;  %216 = vperm.xlu0 %554, %v212_v8   ;;  %v236_v10 = vld [vmem:[%s785_s7] sm:$0xff]  ;;  %v237_v11 = vld [vmem:[%s785_s7 + $0x8] sm:$0xff]  ;;  %v506_v13 = vpack.c.bf16 %v40_v9, %v39_v7 }
   0x4   :  { %504 = vmatpush3.bf16.xpose.msk.msra.mxu1 %vm640_vm1, %v502_v3  ;;  %v518_v12 = vpack.c.bf16 %v237_v11, %v236_v10 }
   0x5   :  { %505 = vmatprep.subr.bf16.mxu1 %v581_v2 }
   0x6   :  { %520 = vmatpush3.bf16.xpose.msk.msra.mxu0 %vm640_vm1, %v518_v12 }
   0x7   :  { %13 = vsyncpa [#allocation3], 0  ;;  %521 = vmatprep.subr.bf16.mxu0 %v581_v2  ;;  %v238_v14 = vld [vmem:[%s785_s7 + $0x10] sm:$0xff]  ;;  %v239_v15 = vld [vmem:[%s785_s7 + $0x18] sm:$0xff] }
   0x8   :  { %v522_v16 = vpack.c.bf16 %v239_v15, %v238_v14  ;;  %v32_v17 = vld [vmem:[%s781_s3] sm:$0xff]  ;;  %v33_v18 = vld [vmem:[%s781_s3 + $0x8] sm:$0xff]  ;;  %v34_v25 = vld [vmem:[%s781_s3 + $0x10] sm:$0xff] }
   0x9   :  { %v36_v19 = vld [vmem:[%s779_s1] sm:$0xff]  ;;  %v510_v20 = vpack.c.bf16 %v33_v18, %v32_v17  ;;  %v241_v22 = vld [vmem:[%s785_s7 + $0x28] sm:$0xff]  ;;  %v35_v26 = vld [vmem:[%s781_s3 + $0x18] sm:$0xff] }
   0xa   :  { %v240_v21 = vld [vmem:[%s785_s7 + $0x20] sm:$0xff]  ;;  %v514_v27 = vpack.c.bf16 %v35_v26, %v34_v25  ;;  %v242_v28 = vld [vmem:[%s785_s7 + $0x30] sm:$0xff]  ;;  %v243_v29 = vld [vmem:[%s785_s7 + $0x38] sm:$0xff] }
   0xb   :  { %v30_v23 = vld [vmem:[%s778_s0] sm:$0xff]  ;;  %v526_v24 = vpack.c.bf16 %v241_v22, %v240_v21  ;;  %v530_v30 = vpack.c.bf16 %v243_v29, %v242_v28  ;;  %v245_v33 = vld [vmem:[%s785_s7 + $0x48] sm:$0xff]  ;;  %v246_v35 = vld [vmem:[%s785_s7 + $0x50] sm:$0xff] }
   0xc   :  { %508 = vmatpush3.bf16.xpose.msk.msra.mxu1 %vm640_vm1, %v506_v13  ;;  %555 = vtanh.f32 %v30_v23  ;;  %v244_v32 = vld [vmem:[%s785_s7 + $0x40] sm:$0xff]  ;;  %v247_v36 = vld [vmem:[%s785_s7 + $0x58] sm:$0xff]  ;;  %v249_v39 = vld [vmem:[%s785_s7 + $0x68] sm:$0xff] }
   0xd   :  { %509 = vmatprep.subr.bf16.mxu1 %v581_v2  ;;  %v534_v34 = vpack.c.bf16 %v245_v33, %v244_v32  ;;  %v538_v37 = vpack.c.bf16 %v247_v36, %v246_v35  ;;  %v248_v38 = vld [vmem:[%s785_s7 + $0x60] sm:$0xff]  ;;  %v250_v41 = vld [vmem:[%s785_s7 + $0x70] sm:$0xff]  ;;  %v251_v42 = vld [vmem:[%s785_s7 + $0x78] sm:$0xff]  ;;  %s585_s7 = smov [#allocation2]  }
   0xe   :  { %524 = vmatpush3.bf16.xpose.msk.msra.mxu0 %vm640_vm1, %v522_v16  ;;  %v542_v40 = vpack.c.bf16 %v249_v39, %v248_v38  ;;  %v546_v43 = vpack.c.bf16 %v251_v42, %v250_v41  ;;  %v398_v46 = vld [vmem:[%s783_s5] ss:$0 sm:$0xff]  ;;  %s380_s11 = sshll.u32 %s585_s7, 4  ;;  %s381_s11 = int_to_ptr.vmem [resolvable:$true] %s380_s11 }
   0xf   :  { %525 = vmatprep.subr.bf16.mxu0 %v581_v2  ;;  %v399_v52 = vld [vmem:[%s784_s6] ss:$0 sm:$0xff]  ;;  %s557_s5 = scalar_lea.vmem %s381_s11, 128  ;;  %p562_p1 = scmp.lt.s32.totalorder %s381_s11, %s381_s11 }
  0x10   :  { %p558_p0 = scmp.ne.s32.totalorder %s381_s11, %s557_s5  ;;  %p563_p2 = scmp.lt.s32.totalorder %s557_s5, %s557_s5 }
  0x12   :  { %p564_p3 = por %p563_p2, %p562_p1 }
  0x13   :  { %453 = vmatmul.mubr.msk.f32.vlgmr.msra.gmra.mrb[0].mxu1 %vm41_vm0, %v36_v19 }
  0x14   :  { %512 = vmatpush3.bf16.xpose.msk.msra.mxu1 %vm640_vm1, %v510_v20  ;;  %463 = vmatprep.mubr.msk.f32.mxu1 %vm582_vm2, %v583_v5  ;;  %p565_p4 = pnand %p564_p3, %p558_p0 }
  0x15   :  { %513 = vmatprep.subr.bf16.mxu1 %v581_v2 }
  0x16   :  { %528 = vmatpush3.bf16.xpose.msk.msra.mxu0 %vm640_vm1, %v526_v24  ;;  %v556_v31 = vpop.eup %555 }
  0x17   :  { %529 = vmatprep.subr.bf16.mxu0 %v581_v2 }
  0x1c   :  { %516 = vmatpush3.bf16.xpose.msk.msra.mxu1 %vm640_vm1, %v514_v27 }
  0x1e   :  { %532 = vmatpush3.bf16.xpose.msk.msra.mxu0 %vm640_vm1, %v530_v30 }
  0x1f   :  { %533 = vmatprep.subr.bf16.mxu0 %v581_v2 }
  0x23   :  { %464 = vmatmul.mubr.msk.f32.vlgmr.msra.gmra.mrb[2].mxu1 %vm41_vm0, %v556_v31 }
  0x26   :  { %536 = vmatpush3.bf16.xpose.msk.msra.mxu0 %vm640_vm1, %v534_v34 }
  0x27   :  { %537 = vmatprep.subr.bf16.mxu0 %v581_v2 }
  0x2e   :  { %540 = vmatpush3.bf16.xpose.msk.msra.mxu0 %vm640_vm1, %v538_v37 }
  0x2f   :  { %541 = vmatprep.subr.bf16.mxu0 %v581_v2 }
  0x36   :  { %544 = vmatpush3.bf16.xpose.msk.msra.mxu0 %vm640_vm1, %v542_v40 }
  0x37   :  { %545 = vmatprep.subr.bf16.mxu0 %v581_v2 }
  0x3e   :  { %548 = vmatpush3.bf16.xpose.msk.msra.mxu0 %vm640_vm1, %v546_v43 }
  0x82   :  { %v217_v47 = vpop.permute.xlu0 %216 }
  0x83   :  { %v225_v48 = vmul.f32 %v398_v46, %v217_v47 }
  0xe6   :  { %v123_v44 = vpop.f32.mrb[0].mxu1 }
  0xe7   :  { %v454_v45 = vpop.f32.mrb[1].mxu1 }
  0xf6   :  { %v208_v49 = vpop.f32.mrb[2].mxu1 }
  0xf7   :  { %v209_v50 = vadd.f32 %v208_v49, %v123_v44  ;;  %v465_v51 = vpop.f32.mrb[3].mxu1 }
  0xf9   :  { %v226_v53 = vadd.f32 %v225_v48, %v209_v50 }
  0xfb   :  { %v234_v54 = vadd.f32 %v399_v52, %v226_v53 }
  0xfd   :  { %v235_v55 = vmax.f32 %v234_v54, 0.0 }
  0xff   :  { %499 = vmatmul.mubr.msk.f32.vlgmr.msra.gmra.mrb[0].mxu0 %vm41_vm0, %v235_v55 }
 0x1d2   :  { %v369_v56 = vpop.f32.mrb[0].mxu0 }
 0x1d3   :  { %373 = vst [vmem:[#allocation2] sm:$0xff] %v369_v56  ;;  %v500_v57 = vpop.f32.mrb[1].mxu0 }
 0x1d4   :  { %568 = shalt.err (!%p565_p4)
}
 0x1d5   :  { %s569_s13 = scalar_lea.hbm %s786_s8, 128 }
 0x1d6   :  { %p570_p5 = scmp.ne.s32.totalorder %s786_s8, %s569_s13  ;;  %p573_p6 = scmp.lt.u32.totalorder %s569_s13, %s786_s8 }
 0x1d8   :  { %p575_p7 = pnand %p573_p6, %p570_p5 }
 0x1da   :  { %578 = shalt.err (!%p575_p7)
}
 0x1db   :  { %383 = dma.vmem_to_hbm [thread:$0]  %s381_s11, 128, %s786_s8, [#allocation3]  }
 0x1dc   :  { %579 = dma.done.wait [#allocation3], 128  }
 0x1dd   :  { %580 = vsyncadd [#allocation3], 4294967168 }
 0x1de   :  { %387 = vsyncpa [#allocation3], 1 }

</bundles_post_ra>
